<compile_context>
chip_gen: v7x
topology: tpu7x:2x2x1
jax: 0.10.0
libtpu: 0.0.40
codegen_flags: <defaults>
</compile_context>

<pallas_src>
import jax
import jax.numpy as jnp
from jax.experimental import pallas as pl
from jax.experimental.pallas import tpu as pltpu


IN_FEATURES = 35
HIDDEN = 64
LANE = 128
MAX_TILE_B = 8192


def _instance_scorer_kernel(x_ref, w1_ref, b1_ref, w2_ref, b2_ref,
                            w3_ref, b3_ref, w4_ref, b4_ref, o_ref):
    # Feature-major layout:
    #   x tile : (35, tile_b)   weights: (out, in)   biases: (out, 1)
    #   output : (1, tile_b)    -- lane-dense store
    # The -0.5 input shift is already folded into b1 by the wrapper.
    x = x_ref[...]
    h = jnp.tanh(jnp.dot(w1_ref[...], x,
                         preferred_element_type=jnp.float32) + b1_ref[...])
    h = jnp.tanh(jnp.dot(w2_ref[...], h,
                         preferred_element_type=jnp.float32) + b2_ref[...])
    h = jnp.tanh(jnp.dot(w3_ref[...], h,
                         preferred_element_type=jnp.float32) + b3_ref[...])
    z = jnp.dot(w4_ref[...], h,
                preferred_element_type=jnp.float32) + b4_ref[...]
    o_ref[...] = jax.nn.sigmoid(z).astype(o_ref.dtype)


def _round_up(x, m):
    return ((x + m - 1) // m) * m


def _num_tensorcores():
    """Best-effort detection of per-chip TensorCore count.

    Only v7x has 2 TCs per chip; v5e/v6e are single-TC where splitting the
    grid just adds per-step overhead.  Defaults to 1 on any doubt.
    """
    try:
        kind = (getattr(jax.devices()[0], "device_kind", "") or "").lower()
        if "v7" in kind:
            return 2
    except Exception:  # pragma: no cover - detection is purely advisory
        pass
    return 1


def _choose_tile_b(total, num_cores, cap=MAX_TILE_B):
    """total: batch already rounded up to a multiple of 128 lanes."""
    tile = min(cap, total)
    if num_cores > 1 and total > LANE:
        # Even number of grid steps so both v7x TensorCores get balanced
        # work; single-TC chips keep one large tile per batch.
        steps = max(pl.cdiv(total, tile), num_cores)
        if steps % num_cores:
            steps += num_cores - steps % num_cores
        tile = min(tile, _round_up(pl.cdiv(total, steps), LANE))
    return tile


def instance_scorer(x, params, *, tile_b=None):
    """x: (B, 35) float32. params in torch layout (W: (out,in), b: (out,)).
    Returns (B, 1) float32."""
    w1, b1, w2, b2, w3, b3, w4, b4 = params
    B, F = x.shape
    assert F == IN_FEATURES

    # Fold the constant -0.5 input shift into the first-layer bias
    # (algebraically exact; verified vs. the reference with a tolerance):
    #   W1 @ (x - 0.5) + b1 == W1 @ x + (b1 - 0.5 * sum(W1, axis=1))
    b1_eff = (b1 - 0.5 * jnp.sum(w1, axis=1))[:, None]
    b2c, b3c, b4c = b2[:, None], b3[:, None], b4[:, None]

    num_cores = _num_tensorcores()
    b_lane = _round_up(B, LANE)
    if tile_b is None:
        tile_b = _choose_tile_b(b_lane, num_cores)
    tile_b = max(LANE, _round_up(int(tile_b), LANE))   # lane-aligned

    grid_b = pl.cdiv(b_lane, tile_b)
    b_pad = grid_b * tile_b

    # Feature-major: batch on the 128-lane axis. Zero-padded columns produce
    # harmless outputs that are sliced off below.
    xt = jnp.pad(x.T, ((0, 0), (0, b_pad - B)))

    # Weights/biases are tiny: replicate the full arrays to every grid step.
    def full_spec(shape):
        return pl.BlockSpec(shape, lambda i: (0,) * len(shape))

    out = pl.pallas_call(
        _instance_scorer_kernel,
        out_shape=jax.ShapeDtypeStruct((1, b_pad), jnp.float32),
        grid_spec=pltpu.PrefetchScalarGridSpec(
            num_scalar_prefetch=0,
            grid=(grid_b,),
            in_specs=[
                pl.BlockSpec((IN_FEATURES, tile_b), lambda i: (0, i)),  # x tile
                full_spec(w1.shape), full_spec(b1_eff.shape),
                full_spec(w2.shape), full_spec(b2c.shape),
                full_spec(w3.shape), full_spec(b3c.shape),
                full_spec(w4.shape), full_spec(b4c.shape),
            ],
            out_specs=pl.BlockSpec((1, tile_b), lambda i: (0, i)),
        ),
        compiler_params=pltpu.CompilerParams(
            dimension_semantics=("parallel",),
            # Working set at tile_b=8192: 2x(35,8192) input buffers +
            # 2x(1,8192) output buffers + 3x(64,8192) f32 temporaries
            # ~= 10 MiB, so 32 MiB is safe on every generation including
            # v7x's 64 MiB physical VMEM.
            vmem_limit_bytes=32 * 1024 * 1024,
        ),
    )(xt, w1, b1_eff, w2, b2c, w3, b3c, w4, b4c)

    return out[:, :B].T


def init_params(key):
    """Deterministic synthetic parameters in torch.nn.Linear layout:
    W: (out_features, in_features), b: (out_features,)."""
    dims = [(IN_FEATURES, HIDDEN), (HIDDEN, HIDDEN), (HIDDEN, HIDDEN), (HIDDEN, 1)]
    params = []
    for i, (fan_in, fan_out) in enumerate(dims):
        kw, kb = jax.random.split(jax.random.fold_in(key, i))
        bound = 1.0 / (fan_in ** 0.5)  # mirrors torch.nn.Linear default init
        w = jax.random.uniform(kw, (fan_out, fan_in), jnp.float32, -bound, bound)
        b = jax.random.uniform(kb, (fan_out,), jnp.float32, -bound, bound)
        params += [w, b]
    return tuple(params)


def reference(x, params):
    w1, b1, w2, b2, w3, b3, w4, b4 = params
    h = x - 0.5
    h = jnp.tanh(h @ w1.T + b1)
    h = jnp.tanh(h @ w2.T + b2)
    h = jnp.tanh(h @ w3.T + b3)
    return jax.nn.sigmoid(h @ w4.T + b4)


if __name__ == "__main__":
    key = jax.random.PRNGKey(0)
    kx, kp = jax.random.split(key)

    # Small, ragged batch of 35-dim feature vectors (exercises the
    # lane-padding + slice-back path).
    B = 37
    x = jax.random.uniform(kx, (B, IN_FEATURES), jnp.float32)
    params = init_params(kp)

    out = instance_scorer(x, params)          # auto tile_b
    out = jax.block_until_ready(out)

    ref = reference(x, params)
    assert out.shape == (B, 1)
    assert jnp.allclose(out, ref, atol=1e-5, rtol=1e-5), "mismatch vs reference"
    print("KERNEL_OK")
</pallas_src>

<mosaic_0001>
module attributes {stable_mosaic.version = 11 : i64} {
  func.func @_instance_scorer_kernel(%arg0: i32, %arg1: memref<35x128xf32, #tpu.memory_space<vmem>>, %arg2: memref<64x35xf32, #tpu.memory_space<vmem>>, %arg3: memref<64x1xf32, #tpu.memory_space<vmem>>, %arg4: memref<64x64xf32, #tpu.memory_space<vmem>>, %arg5: memref<64x1xf32, #tpu.memory_space<vmem>>, %arg6: memref<64x64xf32, #tpu.memory_space<vmem>>, %arg7: memref<64x1xf32, #tpu.memory_space<vmem>>, %arg8: memref<1x64xf32, #tpu.memory_space<vmem>>, %arg9: memref<1x1xf32, #tpu.memory_space<vmem>>, %arg10: memref<1x128xf32, #tpu.memory_space<vmem>>) attributes {dimension_semantics = [#tpu.dimension_semantics<parallel>], iteration_bounds = array<i64: 1>, scalar_prefetch = 0 : i64, scratch_operands = 0 : i64, tpu.core_type = #tpu.core_type<tc>, window_params = [{transform_indices = @transform_0, window_bounds = array<i64: 35, 128>}, {pipeline_mode = #tpu.pipeline_mode<synchronous>, transform_indices = @transform_1, window_bounds = array<i64: 64, 35>}, {pipeline_mode = #tpu.pipeline_mode<synchronous>, transform_indices = @transform_2, window_bounds = array<i64: 64, 1>}, {pipeline_mode = #tpu.pipeline_mode<synchronous>, transform_indices = @transform_3, window_bounds = array<i64: 64, 64>}, {pipeline_mode = #tpu.pipeline_mode<synchronous>, transform_indices = @transform_4, window_bounds = array<i64: 64, 1>}, {pipeline_mode = #tpu.pipeline_mode<synchronous>, transform_indices = @transform_5, window_bounds = array<i64: 64, 64>}, {pipeline_mode = #tpu.pipeline_mode<synchronous>, transform_indices = @transform_6, window_bounds = array<i64: 64, 1>}, {pipeline_mode = #tpu.pipeline_mode<synchronous>, transform_indices = @transform_7, window_bounds = array<i64: 1, 64>}, {pipeline_mode = #tpu.pipeline_mode<synchronous>, transform_indices = @transform_8, window_bounds = array<i64: 1, 1>}, {transform_indices = @transform_9, window_bounds = array<i64: 1, 128>}]} {
    %c0 = arith.constant 0 : index
    %c0_0 = arith.constant 0 : index
    %0 = vector.load %arg1[%c0, %c0_0] : memref<35x128xf32, #tpu.memory_space<vmem>>, vector<35x128xf32>
    %c0_1 = arith.constant 0 : index
    %c0_2 = arith.constant 0 : index
    %1 = vector.load %arg2[%c0_1, %c0_2] : memref<64x35xf32, #tpu.memory_space<vmem>>, vector<64x35xf32>
    %cst = arith.constant dense<0.000000e+00> : vector<64x128xf32>
    %2 = tpu.matmul %1, %0, %cst {dimension_numbers = #tpu.dot_dimension_numbers<[1], [0], [0], [1], [0, 0, 1, 1], [], []>} : vector<64x35xf32>, vector<35x128xf32>, vector<64x128xf32> -> vector<64x128xf32>
    %c0_3 = arith.constant 0 : index
    %c0_4 = arith.constant 0 : index
    %3 = vector.load %arg3[%c0_3, %c0_4] : memref<64x1xf32, #tpu.memory_space<vmem>>, vector<64x1xf32>
    %4 = vector.broadcast %3 : vector<64x1xf32> to vector<64x128xf32>
    %5 = arith.addf %2, %4 : vector<64x128xf32>
    %6 = math.tanh %5 : vector<64x128xf32>
    %c0_5 = arith.constant 0 : index
    %c0_6 = arith.constant 0 : index
    %7 = vector.load %arg4[%c0_5, %c0_6] : memref<64x64xf32, #tpu.memory_space<vmem>>, vector<64x64xf32>
    %cst_7 = arith.constant dense<0.000000e+00> : vector<64x128xf32>
    %8 = tpu.matmul %7, %6, %cst_7 {dimension_numbers = #tpu.dot_dimension_numbers<[1], [0], [0], [1], [0, 0, 1, 1], [], []>} : vector<64x64xf32>, vector<64x128xf32>, vector<64x128xf32> -> vector<64x128xf32>
    %c0_8 = arith.constant 0 : index
    %c0_9 = arith.constant 0 : index
    %9 = vector.load %arg5[%c0_8, %c0_9] : memref<64x1xf32, #tpu.memory_space<vmem>>, vector<64x1xf32>
    %10 = vector.broadcast %9 : vector<64x1xf32> to vector<64x128xf32>
    %11 = arith.addf %8, %10 : vector<64x128xf32>
    %12 = math.tanh %11 : vector<64x128xf32>
    %c0_10 = arith.constant 0 : index
    %c0_11 = arith.constant 0 : index
    %13 = vector.load %arg6[%c0_10, %c0_11] : memref<64x64xf32, #tpu.memory_space<vmem>>, vector<64x64xf32>
    %cst_12 = arith.constant dense<0.000000e+00> : vector<64x128xf32>
    %14 = tpu.matmul %13, %12, %cst_12 {dimension_numbers = #tpu.dot_dimension_numbers<[1], [0], [0], [1], [0, 0, 1, 1], [], []>} : vector<64x64xf32>, vector<64x128xf32>, vector<64x128xf32> -> vector<64x128xf32>
    %c0_13 = arith.constant 0 : index
    %c0_14 = arith.constant 0 : index
    %15 = vector.load %arg7[%c0_13, %c0_14] : memref<64x1xf32, #tpu.memory_space<vmem>>, vector<64x1xf32>
    %16 = vector.broadcast %15 : vector<64x1xf32> to vector<64x128xf32>
    %17 = arith.addf %14, %16 : vector<64x128xf32>
    %18 = math.tanh %17 : vector<64x128xf32>
    %c0_15 = arith.constant 0 : index
    %c0_16 = arith.constant 0 : index
    %19 = vector.load %arg8[%c0_15, %c0_16] : memref<1x64xf32, #tpu.memory_space<vmem>>, vector<1x64xf32>
    %cst_17 = arith.constant dense<0.000000e+00> : vector<1x128xf32>
    %20 = tpu.matmul %19, %18, %cst_17 {dimension_numbers = #tpu.dot_dimension_numbers<[1], [0], [0], [1], [0, 0, 1, 1], [], []>} : vector<1x64xf32>, vector<64x128xf32>, vector<1x128xf32> -> vector<1x128xf32>
    %c0_18 = arith.constant 0 : index
    %c0_19 = arith.constant 0 : index
    %21 = vector.load %arg9[%c0_18, %c0_19] : memref<1x1xf32, #tpu.memory_space<vmem>>, vector<1x1xf32>
    %22 = vector.broadcast %21 : vector<1x1xf32> to vector<1x128xf32>
    %23 = arith.addf %20, %22 : vector<1x128xf32>
    %24 = arith.negf %23 : vector<1x128xf32>
    %25 = math.exp %24 : vector<1x128xf32>
    %cst_20 = arith.constant 1.000000e+00 : f32
    %26 = vector.broadcast %cst_20 : f32 to vector<1x128xf32>
    %27 = arith.addf %26, %25 : vector<1x128xf32>
    %28 = arith.divf %26, %27 : vector<1x128xf32>
    %c0_21 = arith.constant 0 : index
    %c0_22 = arith.constant 0 : index
    %29 = vector.load %arg10[%c0_21, %c0_22] : memref<1x128xf32, #tpu.memory_space<vmem>>, vector<1x128xf32>
    tpu.vector_store %arg10[%c0_21, %c0_22], %28 {strides = array<i32>} : memref<1x128xf32, #tpu.memory_space<vmem>>, vector<1x128xf32>,
    return
  }
  func.func @transform_0(%arg0: i32) -> (i32, i32) {
    %c0_i32 = arith.constant 0 : i32
    %c0_i32_0 = arith.constant 0 : i32
    return %c0_i32, %arg0 : i32, i32
  }
  func.func @transform_1(%arg0: i32) -> (i32, i32) {
    %c0_i32 = arith.constant 0 : i32
    %c0_i32_0 = arith.constant 0 : i32
    %c0_i32_1 = arith.constant 0 : i32
    return %c0_i32, %c0_i32_0 : i32, i32
  }
  func.func @transform_2(%arg0: i32) -> (i32, i32) {
    %c0_i32 = arith.constant 0 : i32
    %c0_i32_0 = arith.constant 0 : i32
    %c0_i32_1 = arith.constant 0 : i32
    return %c0_i32, %c0_i32_0 : i32, i32
  }
  func.func @transform_3(%arg0: i32) -> (i32, i32) {
    %c0_i32 = arith.constant 0 : i32
    %c0_i32_0 = arith.constant 0 : i32
    %c0_i32_1 = arith.constant 0 : i32
    return %c0_i32, %c0_i32_0 : i32, i32
  }
  func.func @transform_4(%arg0: i32) -> (i32, i32) {
    %c0_i32 = arith.constant 0 : i32
    %c0_i32_0 = arith.constant 0 : i32
    %c0_i32_1 = arith.constant 0 : i32
    return %c0_i32, %c0_i32_0 : i32, i32
  }
  func.func @transform_5(%arg0: i32) -> (i32, i32) {
    %c0_i32 = arith.constant 0 : i32
    %c0_i32_0 = arith.constant 0 : i32
    %c0_i32_1 = arith.constant 0 : i32
    return %c0_i32, %c0_i32_0 : i32, i32
  }
  func.func @transform_6(%arg0: i32) -> (i32, i32) {
    %c0_i32 = arith.constant 0 : i32
    %c0_i32_0 = arith.constant 0 : i32
    %c0_i32_1 = arith.constant 0 : i32
    return %c0_i32, %c0_i32_0 : i32, i32
  }
  func.func @transform_7(%arg0: i32) -> (i32, i32) {
    %c0_i32 = arith.constant 0 : i32
    %c0_i32_0 = arith.constant 0 : i32
    %c0_i32_1 = arith.constant 0 : i32
    return %c0_i32, %c0_i32_0 : i32, i32
  }
  func.func @transform_8(%arg0: i32) -> (i32, i32) {
    %c0_i32 = arith.constant 0 : i32
    %c0_i32_0 = arith.constant 0 : i32
    %c0_i32_1 = arith.constant 0 : i32
    return %c0_i32, %c0_i32_0 : i32, i32
  }
  func.func @transform_9(%arg0: i32) -> (i32, i32) {
    %c0_i32 = arith.constant 0 : i32
    %c0_i32_0 = arith.constant 0 : i32
    return %c0_i32, %arg0 : i32, i32
  }
}

</mosaic_0001>

<bundles_post_ra>
// kernel: tpu_custom_call.1
= control target key start
LH: loop header
LB: loop body
LE: loop exit
PB: predicated region body
PF: predicated region fallthrough
CT: control target
= control target key end

     0   :  { %s1300_s0 = inlined_call_operand.vmem [shape: f32[35,128], index: 0, kind: input, shape index: {}]   ;;  %s1301_s1 = inlined_call_operand.vmem [shape: f32[64,35], index: 1, kind: input, shape index: {}]   ;;  %s1302_s2 = inlined_call_operand.vmem [shape: f32[64,1], index: 2, kind: input, shape index: {}]   ;;  %s1303_s3 = inlined_call_operand.vmem [shape: f32[64,64], index: 3, kind: input, shape index: {}]   ;;  %s1304_s4 = inlined_call_operand.vmem [shape: f32[64,1], index: 4, kind: input, shape index: {}]   ;;  %s1305_s5 = inlined_call_operand.vmem [shape: f32[64,64], index: 5, kind: input, shape index: {}]   ;;  %s1306_s6 = inlined_call_operand.vmem [shape: f32[64,1], index: 6, kind: input, shape index: {}]   ;;  %s1307_s7 = inlined_call_operand.vmem [shape: f32[1,64], index: 7, kind: input, shape index: {}]   ;;  %s1308_s8 = inlined_call_operand.<no memory space> [shape: f32[1,1], index: 8, kind: input, shape index: {}]   ;;  %s1309_s9 = inlined_call_operand.hbm [shape: f32[1,128], index: 9, kind: output, shape index: {}]  }
   0x1   :  { %v14_v0 = vstv %s1308_s8 }
   0x2   :  { %15 = vst [vmem:[#allocation2] sm:$0x1] %v14_v0 }
   0x3   :  { %v35_v1 = vld [vmem:[%s1300_s0] sm:$0xff]  ;;  %v36_v2 = vld [vmem:[%s1300_s0 + $0x8] sm:$0xff]  ;;  %v37_v3 = vld [vmem:[%s1300_s0 + $0x10] sm:$0xff]  ;;  %vm96_vm0 = vcmask 285696   ;;  %v1043_v7 = vmov 0   ;;  %vm121_vm1 = vcmask 1042432  }
   0x4   :  { %v908_v4 = vpack.c.bf16 %v36_v2, %v35_v1  ;;  %v38_v5 = vld [vmem:[%s1300_s0 + $0x18] sm:$0xff]  ;;  %v40_v6 = vld [vmem:[%s1301_s1] sm:$0xff]  ;;  %965 = vset.pattern.permute.xlu0 %v1043_v7  ;;  %966 = vset.pattern.permute.xlu1 %v1043_v7  ;;  %v50_v10 = vld [vmem:[%s1302_s2 + $0x10] sm:$0xff] }
   0x5   :  { %v912_v8 = vpack.c.bf16 %v38_v5, %v37_v3  ;;  %821 = vmatprep.mubr.msk.f32.mxu0 %vm96_vm0, %v40_v6  ;;  %v48_v9 = vld [vmem:[%s1302_s2] sm:$0xff]  ;;  %v49_v12 = vld [vmem:[%s1302_s2 + $0x8] sm:$0xff]  ;;  %68 = vperm.xlu1 %966, %v50_v10   ;;  %v51_v13 = vld [vmem:[%s1302_s2 + $0x18] sm:$0xff] }
   0x6   :  { %909 = vmatprep.subr.bf16.mxu0 %v908_v4  ;;  %58 = vperm.xlu0 %965, %v48_v9   ;;  %v39_v11 = vld [vmem:[%s1300_s0 + $0x20] sm:$0x7]  ;;  %v41_v14 = vld [vmem:[%s1301_s1 + $0x8] sm:$0xff]  ;;  %v42_v16 = vld [vmem:[%s1301_s1 + $0x10] sm:$0xff] }
   0x7   :  { %911 = vmatpush3.bf16.msra.mxu0 %v908_v4  ;;  %v52_v15 = vld [vmem:[%s1302_s2 + $0x20] sm:$0xff]  ;;  %v53_v17 = vld [vmem:[%s1302_s2 + $0x28] sm:$0xff] }
   0x8   :  { %913 = vmatprep.subr.bf16.mxu0 %v912_v8 }
   0x9   :  { %73 = vperm.xlu1 %966, %v51_v13  }
   0xa   :  { %63 = vperm.xlu0 %965, %v49_v12  }
   0xb   :  { %915 = vmatpush3.bf16.msra.mxu0 %v912_v8 }
   0xc   :  { %819 = vmatprep.subr.msk.mxu0 %vm121_vm1, %v39_v11 }
   0xf   :  { %820 = vmatpush3.msk.msra.mxu0 %vm121_vm1, %v39_v11 }
  0x10   :  { %16 = vsyncpa [#allocation4], 0  ;;  %822 = vmatmul.mubr.msk.f32.vlgmr.msra.gmra.mrb[0].mxu0 %vm96_vm0, %v41_v14  ;;  %78 = vperm.xlu0 %965, %v52_v15   ;;  %v43_v18 = vld [vmem:[%s1301_s1 + $0x18] sm:$0xff]  ;;  %v54_v19 = vld [vmem:[%s1302_s2 + $0x30] sm:$0xff]  ;;  %vm294_vm2 = vcmask 523264   ;;  %vm1045_vm3 = vmmov 0  }
  0x11   :  { %824 = vmatprep.mubr.msk.f32.mxu0 %vm96_vm0, %v42_v16  ;;  %83 = vperm.xlu1 %966, %v53_v17   ;;  %v44_v20 = vld [vmem:[%s1301_s1 + $0x20] sm:$0xff]  ;;  %v55_v21 = vld [vmem:[%s1302_s2 + $0x38] sm:$0xff]  ;;  %v45_v22 = vld [vmem:[%s1301_s1 + $0x28] sm:$0xff]  ;;  %s1047_s16 = smov [#allocation3]  }
  0x12   :  { %v246_v23 = vld [vmem:[%s1304_s4] sm:$0xff]  ;;  %v46_v24 = vld [vmem:[%s1301_s1 + $0x30] sm:$0xff]  ;;  %v247_v25 = vld [vmem:[%s1304_s4 + $0x8] sm:$0xff]  ;;  %s722_s17 = sshll.u32 %s1047_s16, 4  ;;  %s723_s17 = int_to_ptr.vmem [resolvable:$true] %s722_s17 }
  0x13   :  { %v47_v26 = vld [vmem:[%s1301_s1 + $0x38] sm:$0xff]  ;;  %v248_v27 = vld [vmem:[%s1304_s4 + $0x10] sm:$0xff]  ;;  %v250_v29 = vld [vmem:[%s1304_s4 + $0x20] sm:$0xff]  ;;  %s1023_s1 = scalar_lea.vmem %s723_s17, 32  ;;  %p1024_p1 = scmp.lt.s32.totalorder %s723_s17, %s723_s17 }
  0x14   :  { %825 = vmatmul.mubr.msk.f32.gmra.mrb[2].mxu0 %vm96_vm0, %v43_v18  ;;  %88 = vperm.xlu0 %965, %v54_v19   ;;  %v249_v28 = vld [vmem:[%s1304_s4 + $0x18] sm:$0xff]  ;;  %v251_v30 = vld [vmem:[%s1304_s4 + $0x28] sm:$0xff]  ;;  %v252_v31 = vld [vmem:[%s1304_s4 + $0x30] sm:$0xff] }
  0x15   :  { %827 = vmatprep.mubr.msk.f32.mxu0 %vm96_vm0, %v44_v20  ;;  %93 = vperm.xlu1 %966, %v55_v21   ;;  %v253_v32 = vld [vmem:[%s1304_s4 + $0x38] sm:$0xff]  ;;  %v440_v33 = vld [vmem:[%s1306_s6] sm:$0xff]  ;;  %v441_v34 = vld [vmem:[%s1306_s6 + $0x8] sm:$0xff] }
  0x16   :  { %v442_v35 = vld [vmem:[%s1306_s6 + $0x10] sm:$0xff]  ;;  %v443_v36 = vld [vmem:[%s1306_s6 + $0x18] sm:$0xff]  ;;  %v444_v37 = vld [vmem:[%s1306_s6 + $0x20] sm:$0xff] }
  0x17   :  { %v445_v38 = vld [vmem:[%s1306_s6 + $0x28] sm:$0xff]  ;;  %v446_v39 = vld [vmem:[%s1306_s6 + $0x30] sm:$0xff]  ;;  %v447_v40 = vld [vmem:[%s1306_s6 + $0x38] sm:$0xff] }
  0x18   :  { %828 = vmatmul.mubr.msk.f32.gmra.mrb[4].mxu0 %vm96_vm0, %v45_v22  ;;  %256 = vperm.xlu0 %965, %v246_v23   ;;  %v626_v41 = vld [vmem:[#allocation2] sm:$0x1]  ;;  %v239_v15 = vld [vmem:[%s1303_s3 + $0x8] sm:$0xff]  ;;  %v240_v16 = vld [vmem:[%s1303_s3 + $0x10] sm:$0xff] }
  0x19   :  { %830 = vmatprep.mubr.msk.f32.mxu0 %vm96_vm0, %v46_v24  ;;  %261 = vperm.xlu1 %966, %v247_v25   ;;  %v238_v42 = vld [vmem:[%s1303_s3] sm:$0xff]  ;;  %v241_v17 = vld [vmem:[%s1303_s3 + $0x18] sm:$0xff]  ;;  %v243_v19 = vld [vmem:[%s1303_s3 + $0x28] sm:$0xff] }
  0x1a   :  { %849 = vmatprep.mubr.msk.f32.mxu1 %vm294_vm2, %v238_v42  ;;  %v242_v18 = vld [vmem:[%s1303_s3 + $0x20] sm:$0xff]  ;;  %v244_v20 = vld [vmem:[%s1303_s3 + $0x30] sm:$0xff]  ;;  %v245_v21 = vld [vmem:[%s1303_s3 + $0x38] sm:$0xff] }
  0x1b   :  { %v432_v22 = vld [vmem:[%s1305_s5] sm:$0xff] }
  0x1c   :  { %831 = vmatmul.mubr.msk.f32.gmra.mrb[6].mxu0 %vm96_vm0, %v47_v26  ;;  %266 = vperm.xlu0 %965, %v248_v27  }
  0x1d   :  { %271 = vperm.xlu1 %966, %v249_v28   ;;  %877 = vmatprep.mubr.msk.f32.mxu0 %vm294_vm2, %v432_v22 }
  0x20   :  { %276 = vperm.xlu0 %965, %v250_v29  }
  0x21   :  { %281 = vperm.xlu1 %966, %v251_v30  }
  0x24   :  { %286 = vperm.xlu0 %965, %v252_v31  }
  0x25   :  { %291 = vperm.xlu1 %966, %v253_v32  }
  0x28   :  { %450 = vperm.xlu0 %965, %v440_v33  }
  0x29   :  { %455 = vperm.xlu1 %966, %v441_v34  }
  0x2c   :  { %460 = vperm.xlu0 %965, %v442_v35  }
  0x2d   :  { %465 = vperm.xlu1 %966, %v443_v36  }
  0x30   :  { %470 = vperm.xlu0 %965, %v444_v37  }
  0x31   :  { %475 = vperm.xlu1 %966, %v445_v38  }
  0x34   :  { %480 = vperm.xlu0 %965, %v446_v39  }
  0x35   :  { %485 = vperm.xlu1 %966, %v447_v40  }
  0x38   :  { %629 = vperm.xlu0 %965, %v626_v41  }
  0x84   :  { %v69_v44 = vpop.permute.xlu1 %68 }
  0x85   :  { %v59_v43 = vpop.permute.xlu0 %58 }
  0x88   :  { %v74_v46 = vpop.permute.xlu1 %73 }
  0x89   :  { %v64_v45 = vpop.permute.xlu0 %63 }
  0x8f   :  { %v79_v56 = vpop.permute.xlu0 %78 }
  0x90   :  { %v84_v54 = vpop.permute.xlu1 %83 }
  0x93   :  { %v89_v0 = vpop.permute.xlu0 %88 }
  0x94   :  { %v94_v61 = vpop.permute.xlu1 %93 }
  0x97   :  { %v257_v24 = vpop.permute.xlu0 %256 }
  0x98   :  { %v262_v23 = vpop.permute.xlu1 %261 }
  0x9b   :  { %v267_v27 = vpop.permute.xlu0 %266 }
  0x9c   :  { %v272_v25 = vpop.permute.xlu1 %271 }
  0x9f   :  { %v277_v36 = vpop.permute.xlu0 %276 }
  0xa0   :  { %v282_v34 = vpop.permute.xlu1 %281 }
  0xa4   :  { %v292_v41 = vpop.permute.xlu1 %291 }
  0xe3   :  { %v823_v47 = vpop.f32.mrb[0].mxu0 }
  0xe4   :  { %v197_v48 = vadd.f32 %v823_v47, %v64_v45  ;;  %v191_v49 = vpop.f32.mrb[1].mxu0 }
  0xe5   :  { %v192_v50 = vadd.f32 %v191_v49, %v59_v43 }
  0xe6   :  { %967 = vtanh.f32 %v197_v48 }
  0xe7   :  { %969 = vtanh.f32 %v192_v50  ;;  %v826_v51 = vpop.f32.mrb[2].mxu0 }
  0xe8   :  { %v207_v52 = vadd.f32 %v826_v51, %v74_v46  ;;  %v201_v53 = vpop.f32.mrb[3].mxu0 }
  0xe9   :  { %v202_v55 = vadd.f32 %v201_v53, %v69_v44  ;;  %v287_v44 = vpop.permute.xlu0 %286 }
  0xea   :  { %971 = vtanh.f32 %v207_v52 }
  0xeb   :  { %973 = vtanh.f32 %v202_v55  ;;  %v829_v57 = vpop.f32.mrb[4].mxu0 }
  0xec   :  { %v217_v58 = vadd.f32 %v829_v57, %v84_v54  ;;  %v211_v59 = vpop.f32.mrb[5].mxu0 }
  0xed   :  { %v212_v60 = vadd.f32 %v211_v59, %v79_v56  ;;  %v433_v59 = vld [vmem:[%s1305_s5 + $0x8] sm:$0xff] }
  0xee   :  { %975 = vtanh.f32 %v217_v58 }
  0xef   :  { %977 = vtanh.f32 %v212_v60  ;;  %v832_v62 = vpop.f32.mrb[6].mxu0  ;;  %v434_v60 = vld [vmem:[%s1305_s5 + $0x10] sm:$0xff] }
  0xf0   :  { %v968_v63 = vpop.eup %967  ;;  %v227_v1 = vadd.f32 %v832_v62, %v94_v61  ;;  %v221_v2 = vpop.f32.mrb[7].mxu0  ;;  %v435_v61 = vld [vmem:[%s1305_s5 + $0x18] sm:$0xff]  ;;  %v436_v62 = vld [vmem:[%s1305_s5 + $0x20] sm:$0xff] }
  0xf1   :  { %v970_v3 = vpop.eup %969  ;;  %v222_v4 = vadd.f32 %v221_v2, %v89_v0  ;;  %v438_v0 = vld [vmem:[%s1305_s5 + $0x30] sm:$0xff]  ;;  %v1044_v2 = vmov 0.0|0.0  }
  0xf2   :  { %979 = vtanh.f32 %v227_v1  ;;  %v916_v5 = vpack.c.bf16 %v968_v63, %v970_v3  ;;  %v437_v63 = vld [vmem:[%s1305_s5 + $0x28] sm:$0xff]  ;;  %v439_v1 = vld [vmem:[%s1305_s5 + $0x38] sm:$0xff]  ;;  %v1046_v3 = vmov 0.0  }
  0xf3   :  { %981 = vtanh.f32 %v222_v4  ;;  %v456_v4 = vpop.permute.xlu1 %455 }
  0xf4   :  { %v972_v6 = vpop.eup %971  ;;  %917 = vmatprep.subr.bf16.mxu1 %v916_v5 }
  0xf5   :  { %v974_v7 = vpop.eup %973  ;;  %919 = vmatpush3.bf16.msra.mxu1 %v916_v5  ;;  %v451_v5 = vpop.permute.xlu0 %450 }
  0xf6   :  { %v920_v8 = vpack.c.bf16 %v972_v6, %v974_v7 }
  0xf7   :  { %v466_v6 = vpop.permute.xlu1 %465 }
  0xf8   :  { %v976_v9 = vpop.eup %975  ;;  %921 = vmatprep.subr.bf16.mxu1 %v920_v8 }
  0xf9   :  { %v978_v10 = vpop.eup %977  ;;  %923 = vmatpush3.bf16.msra.mxu1 %v920_v8  ;;  %v461_v8 = vpop.permute.xlu0 %460 }
  0xfa   :  { %v924_v11 = vpack.c.bf16 %v976_v9, %v978_v10 }
  0xfc   :  { %v980_v12 = vpop.eup %979  ;;  %925 = vmatprep.subr.bf16.mxu1 %v924_v11 }
  0xfd   :  { %v982_v13 = vpop.eup %981  ;;  %927 = vmatpush3.bf16.msra.mxu1 %v924_v11 }
  0xfe   :  { %v928_v14 = vpack.c.bf16 %v980_v12, %v982_v13 }
 0x100   :  { %929 = vmatprep.subr.bf16.mxu1 %v928_v14 }
 0x101   :  { %931 = vmatpush3.bf16.msra.mxu1 %v928_v14 }
 0x102   :  { %948 = vmatprep.subr.bf16.mxu1 %v1044_v2 }
 0x104   :  { %850 = vmatmul.mubr.msk.f32.vlgmr.msra.gmra.mrb[0].mxu1 %vm294_vm2, %v239_v15  ;;  %v476_v15 = vpop.permute.xlu1 %475 }
 0x105   :  { %852 = vmatprep.mubr.msk.f32.mxu1 %vm294_vm2, %v240_v16 }
 0x108   :  { %853 = vmatmul.mubr.msk.f32.gmra.mrb[2].mxu1 %vm294_vm2, %v241_v17  ;;  %v471_v17 = vpop.permute.xlu0 %470  ;;  %v486_v22 = vpop.permute.xlu1 %485 }
 0x109   :  { %855 = vmatprep.mubr.msk.f32.mxu1 %vm294_vm2, %v242_v18 }
 0x10c   :  { %856 = vmatmul.mubr.msk.f32.gmra.mrb[4].mxu1 %vm294_vm2, %v243_v19 }
 0x10d   :  { %858 = vmatprep.mubr.msk.f32.mxu1 %vm294_vm2, %v244_v20 }
 0x110   :  { %859 = vmatmul.mubr.msk.f32.gmra.mrb[6].mxu1 %vm294_vm2, %v245_v21 }
 0x111   :  { %905 = vmatprep.mubr.msk.f32.mxu1 %vm1045_vm3, %v1046_v3 }
 0x1d7   :  { %v851_v26 = vpop.f32.mrb[0].mxu1 }
 0x1d8   :  { %v391_v28 = vadd.f32 %v851_v26, %v262_v23  ;;  %v385_v29 = vpop.f32.mrb[1].mxu1 }
 0x1d9   :  { %v386_v30 = vadd.f32 %v385_v29, %v257_v24 }
 0x1da   :  { %983 = vtanh.f32 %v391_v28 }
 0x1db   :  { %985 = vtanh.f32 %v386_v30  ;;  %v854_v31 = vpop.f32.mrb[2].mxu1 }
 0x1dc   :  { %v401_v32 = vadd.f32 %v854_v31, %v272_v25  ;;  %v395_v33 = vpop.f32.mrb[3].mxu1  ;;  %v481_v25 = vpop.permute.xlu0 %480 }
 0x1dd   :  { %v396_v35 = vadd.f32 %v395_v33, %v267_v27 }
 0x1de   :  { %987 = vtanh.f32 %v401_v32 }
 0x1df   :  { %989 = vtanh.f32 %v396_v35  ;;  %v857_v37 = vpop.f32.mrb[4].mxu1 }
 0x1e0   :  { %v411_v38 = vadd.f32 %v857_v37, %v282_v34  ;;  %v405_v39 = vpop.f32.mrb[5].mxu1 }
 0x1e1   :  { %v406_v40 = vadd.f32 %v405_v39, %v277_v36 }
 0x1e2   :  { %991 = vtanh.f32 %v411_v38 }
 0x1e3   :  { %993 = vtanh.f32 %v406_v40  ;;  %v860_v42 = vpop.f32.mrb[6].mxu1  ;;  %v625_v40 = vld [vmem:[%s1307_s7] sm:$0x1]  ;;  %s1019_s7 = scalar_lea.vmem %s723_s17, 16 }
 0x1e4   :  { %v984_v43 = vpop.eup %983  ;;  %v421_v45 = vadd.f32 %v860_v42, %v292_v41  ;;  %v415_v46 = vpop.f32.mrb[7].mxu1  ;;  %v632_v41 = vlaneseq  ;;  %p1020_p0 = scmp.ne.s32.totalorder %s723_s17, %s1019_s7  ;;  %p1025_p2 = scmp.lt.s32.totalorder %s1023_s1, %s1019_s7 }
 0x1e5   :  { %v986_v47 = vpop.eup %985  ;;  %v416_v48 = vadd.f32 %v415_v46, %v287_v44  ;;  %v630_v44 = vpop.permute.xlu0 %629 }
 0x1e6   :  { %995 = vtanh.f32 %v421_v45  ;;  %v932_v49 = vpack.c.bf16 %v984_v43, %v986_v47  ;;  %v633_v42 = vshrl.u32 %v632_v41, 7  ;;  %p1026_p3 = por %p1025_p2, %p1024_p1 }
 0x1e7   :  { %997 = vtanh.f32 %v416_v48 }
 0x1e8   :  { %v988_v50 = vpop.eup %987  ;;  %933 = vmatprep.subr.bf16.mxu0 %v932_v49  ;;  %v634_v43 = vsub.s32 0, %v633_v42  ;;  %p1027_p4 = pnand %p1026_p3, %p1020_p0 }
 0x1e9   :  { %v990_v51 = vpop.eup %989  ;;  %935 = vmatpush3.bf16.msra.mxu0 %v932_v49 }
 0x1ea   :  { %v936_v52 = vpack.c.bf16 %v988_v50, %v990_v51  ;;  %v635_v45 = vrot.slane %v630_v44, %v634_v43 }
 0x1ec   :  { %v992_v53 = vpop.eup %991  ;;  %937 = vmatprep.subr.bf16.mxu0 %v936_v52 }
 0x1ed   :  { %v994_v54 = vpop.eup %993  ;;  %939 = vmatpush3.bf16.msra.mxu0 %v936_v52 }
 0x1ee   :  { %v940_v55 = vpack.c.bf16 %v992_v53, %v994_v54 }
 0x1f0   :  { %v996_v56 = vpop.eup %995  ;;  %941 = vmatprep.subr.bf16.mxu0 %v940_v55 }
 0x1f1   :  { %v998_v57 = vpop.eup %997  ;;  %943 = vmatpush3.bf16.msra.mxu0 %v940_v55 }
 0x1f2   :  { %v944_v58 = vpack.c.bf16 %v996_v56, %v998_v57 }
 0x1f4   :  { %945 = vmatprep.subr.bf16.mxu0 %v944_v58 }
 0x1f5   :  { %947 = vmatpush3.bf16.msra.mxu0 %v944_v58 }
 0x1f8   :  { %878 = vmatmul.mubr.msk.f32.vlgmr.msra.gmra.mrb[8].mxu0 %vm294_vm2, %v433_v59 }
 0x1f9   :  { %880 = vmatprep.mubr.msk.f32.mxu0 %vm294_vm2, %v434_v60 }
 0x1fc   :  { %881 = vmatmul.mubr.msk.f32.gmra.mrb[10].mxu0 %vm294_vm2, %v435_v61 }
 0x1fd   :  { %883 = vmatprep.mubr.msk.f32.mxu0 %vm294_vm2, %v436_v62 }
 0x200   :  { %884 = vmatmul.mubr.msk.f32.gmra.mrb[12].mxu0 %vm294_vm2, %v437_v63 }
 0x201   :  { %886 = vmatprep.mubr.msk.f32.mxu0 %vm294_vm2, %v438_v0 }
 0x204   :  { %887 = vmatmul.mubr.msk.f32.gmra.mrb[14].mxu0 %vm294_vm2, %v439_v1 }
 0x2cb   :  { %v879_v7 = vpop.f32.mrb[8].mxu0 }
 0x2cc   :  { %v584_v9 = vadd.f32 %v879_v7, %v456_v4  ;;  %v578_v10 = vpop.f32.mrb[9].mxu0 }
 0x2cd   :  { %v579_v11 = vadd.f32 %v578_v10, %v451_v5 }
 0x2ce   :  { %999 = vtanh.f32 %v584_v9 }
 0x2cf   :  { %1001 = vtanh.f32 %v579_v11  ;;  %v882_v12 = vpop.f32.mrb[10].mxu0 }
 0x2d0   :  { %v594_v13 = vadd.f32 %v882_v12, %v466_v6  ;;  %v588_v14 = vpop.f32.mrb[11].mxu0 }
 0x2d1   :  { %v589_v16 = vadd.f32 %v588_v14, %v461_v8 }
 0x2d2   :  { %1003 = vtanh.f32 %v594_v13 }
 0x2d3   :  { %1005 = vtanh.f32 %v589_v16  ;;  %v885_v18 = vpop.f32.mrb[12].mxu0 }
 0x2d4   :  { %v604_v19 = vadd.f32 %v885_v18, %v476_v15  ;;  %v598_v20 = vpop.f32.mrb[13].mxu0 }
 0x2d5   :  { %v599_v21 = vadd.f32 %v598_v20, %v471_v17 }
 0x2d6   :  { %1007 = vtanh.f32 %v604_v19 }
 0x2d7   :  { %1009 = vtanh.f32 %v599_v21  ;;  %v888_v23 = vpop.f32.mrb[14].mxu0 }
 0x2d8   :  { %v1000_v24 = vpop.eup %999  ;;  %v614_v26 = vadd.f32 %v888_v23, %v486_v22  ;;  %v608_v27 = vpop.f32.mrb[15].mxu0 }
 0x2d9   :  { %v1002_v28 = vpop.eup %1001  ;;  %v609_v29 = vadd.f32 %v608_v27, %v481_v25 }
 0x2da   :  { %1011 = vtanh.f32 %v614_v26  ;;  %v949_v30 = vpack.c.bf16 %v1000_v24, %v1002_v28 }
 0x2db   :  { %1013 = vtanh.f32 %v609_v29 }
 0x2dc   :  { %v1004_v31 = vpop.eup %1003  ;;  %950 = vmatpush3.bf16.msra.mxu1 %v949_v30 }
 0x2dd   :  { %v1006_v32 = vpop.eup %1005  ;;  %951 = vmatprep.subr.bf16.mxu1 %v1044_v2 }
 0x2de   :  { %v952_v33 = vpack.c.bf16 %v1004_v31, %v1006_v32 }
 0x2e0   :  { %v1008_v34 = vpop.eup %1007  ;;  %953 = vmatpush3.bf16.msra.mxu1 %v952_v33 }
 0x2e1   :  { %v1010_v35 = vpop.eup %1009  ;;  %954 = vmatprep.subr.bf16.mxu1 %v1044_v2 }
 0x2e2   :  { %v955_v36 = vpack.c.bf16 %v1008_v34, %v1010_v35 }
 0x2e4   :  { %v1012_v37 = vpop.eup %1011  ;;  %956 = vmatpush3.bf16.msra.mxu1 %v955_v36 }
 0x2e5   :  { %v1014_v38 = vpop.eup %1013  ;;  %957 = vmatprep.subr.bf16.mxu1 %v1044_v2 }
 0x2e6   :  { %v958_v39 = vpack.c.bf16 %v1012_v37, %v1014_v38 }
 0x2e8   :  { %959 = vmatpush3.bf16.msra.mxu1 %v958_v39 }
 0x2eb   :  { %906 = vmatmul.mubr.msk.f32.vlgmr.msra.gmra.mrb[8].mxu1 %vm294_vm2, %v625_v40 }
 0x3be   :  { %v705_v46 = vpop.f32.mrb[8].mxu1 }
 0x3bf   :  { %v706_v47 = vadd.f32 %v705_v46, %v635_v45  ;;  %v907_v48 = vpop.f32.mrb[9].mxu1 }
 0x3c1   :  { %v756_v49 = vmul.f32 -1.442695, %v706_v47 }
 0x3c3   :  { %1015 = vpow2.f32 %v756_v49 }
 0x3cd   :  { %v1016_v50 = vpop.eup %1015 }
 0x3ce   :  { %v712_v51 = vadd.f32 1.0, %v1016_v50 }
 0x3d0   :  { %1017 = vrcp.f32 %v712_v51 }
 0x3da   :  { %v1018_v52 = vpop.eup %1017 }
 0x3db   :  { %715 = vst [vmem:[#allocation3] sm:$0x1] %v1018_v52 }
 0x3dc   :  { %1030 = shalt.err (!%p1027_p4)
}
 0x3dd   :  { %s1031_s19 = scalar_lea.hbm %s1309_s9, 16 }
 0x3de   :  { %p1032_p5 = scmp.ne.s32.totalorder %s1309_s9, %s1031_s19  ;;  %p1035_p6 = scmp.lt.u32.totalorder %s1031_s19, %s1309_s9 }
 0x3e0   :  { %p1037_p7 = pnand %p1035_p6, %p1032_p5 }
 0x3e2   :  { %1040 = shalt.err (!%p1037_p7)
}
 0x3e3   :  { %725 = dma.vmem_to_hbm [thread:$0]  %s723_s17, 16, %s1309_s9, [#allocation4]  }
 0x3e4   :  { %1041 = dma.done.wait [#allocation4], 16  }
 0x3e5   :  { %1042 = vsyncadd [#allocation4], 4294967280 }
 0x3e6   :  { %729 = vsyncpa [#allocation4], 1 }

</bundles_post_ra>
